<compile_context>
chip_gen: v5e
topology: v5e:2x2
jax: 0.10.0
libtpu: 0.0.40
codegen_flags: <defaults>
</compile_context>

<pallas_src>
import jax
import jax.numpy as jnp
from jax.experimental import pallas as pl
from jax.experimental.pallas import tpu as pltpu


def _identity_copy_kernel(x_ref, o_ref):
    # Lane-dense full-tile copy: trailing dim is c_in (multiple-of-128-friendly
    # or equal to the full array dim), so this lowers to unmasked vector stores.
    o_ref[...] = x_ref[...]


def reshaper_forward(x, h, w, *, block_rows=1024):
    """Pallas equivalent of Reshaper(h, w).forward(x). x: (bs, c_in)."""
    bs, c_in = x.shape
    assert c_in % (h * w) == 0, "c_in must be divisible by h*w"
    c_out = c_in // (h * w)

    # Tile only over batch rows; keep c_in whole as the trailing (lane) axis.
    block_rows = min(block_rows, bs)
    grid = (pl.cdiv(bs, block_rows),)

    flat = pl.pallas_call(
        _identity_copy_kernel,
        out_shape=jax.ShapeDtypeStruct((bs, c_in), x.dtype),
        grid=grid,
        in_specs=[pl.BlockSpec((block_rows, c_in), lambda i: (i, 0))],
        out_specs=pl.BlockSpec((block_rows, c_in), lambda i: (i, 0)),
        compiler_params=pltpu.CompilerParams(
            dimension_semantics=("parallel",)),
        cost_estimate=pl.CostEstimate(
            flops=0,
            transcendentals=0,
            bytes_accessed=2 * x.size * x.dtype.itemsize),
    )(x)

    # Zero-cost C-order axis split (metadata only): (bs, c_in) -> (bs, c_out, h, w).
    # TODO(synk): in a real pipeline, delete the pallas_call above and fold this
    # 4-D view into the consumer kernel's BlockSpec index arithmetic instead.
    return flat.reshape(bs, c_out, h, w)


if __name__ == "__main__":
    # Small shapes consistent with the module: h=w=4, bs=2, c_in=32 -> c_out=2.
    h, w = 4, 4
    bs, c_in = 2, 32

    key = jax.random.PRNGKey(0)
    x = jax.random.normal(key, (bs, c_in), dtype=jnp.float32)

    out = jax.block_until_ready(reshaper_forward(x, h, w))

    # Sanity check against pure-JAX reference (same semantics as torch.reshape).
    ref = x.reshape(bs, c_in // (h * w), h, w)
    assert out.shape == (bs, c_in // (h * w), h, w)
    assert out.dtype == x.dtype
    assert jnp.array_equal(out, ref)

    print("KERNEL_OK")
</pallas_src>

<mosaic_0001>
module attributes {stable_mosaic.version = 11 : i64} {
  func.func @_identity_copy_kernel(%arg0: i32, %arg1: memref<2x32xf32, #tpu.memory_space<vmem>>, %arg2: memref<2x32xf32, #tpu.memory_space<vmem>>) attributes {dimension_semantics = [#tpu.dimension_semantics<parallel>], iteration_bounds = array<i64: 1>, scalar_prefetch = 0 : i64, scratch_operands = 0 : i64, tpu.core_type = #tpu.core_type<tc>, window_params = [{transform_indices = @transform_0, window_bounds = array<i64: 2, 32>}, {transform_indices = @transform_1, window_bounds = array<i64: 2, 32>}]} {
    %c0 = arith.constant 0 : index
    %c0_0 = arith.constant 0 : index
    %0 = vector.load %arg1[%c0, %c0_0] : memref<2x32xf32, #tpu.memory_space<vmem>>, vector<2x32xf32>
    %c0_1 = arith.constant 0 : index
    %c0_2 = arith.constant 0 : index
    %1 = vector.load %arg2[%c0_1, %c0_2] : memref<2x32xf32, #tpu.memory_space<vmem>>, vector<2x32xf32>
    tpu.vector_store %arg2[%c0_1, %c0_2], %0 {strides = array<i32>} : memref<2x32xf32, #tpu.memory_space<vmem>>, vector<2x32xf32>,
    return
  }
  func.func @transform_0(%arg0: i32) -> (i32, i32) {
    %c0_i32 = arith.constant 0 : i32
    %c0_i32_0 = arith.constant 0 : i32
    return %arg0, %c0_i32 : i32, i32
  }
  func.func @transform_1(%arg0: i32) -> (i32, i32) {
    %c0_i32 = arith.constant 0 : i32
    %c0_i32_0 = arith.constant 0 : i32
    return %arg0, %c0_i32 : i32, i32
  }
}

</mosaic_0001>

<bundles_post_ra>
// kernel: tpu_custom_call.1
= control target key start
LH: loop header
LB: loop body
LE: loop exit
PB: predicated region body
PF: predicated region fallthrough
CT: control target
= control target key end

     0   :  { %6 = vsyncpa [#allocation3], 0  ;;  %s115_s0 = inlined_call_operand.hbm [shape: f32[2,32], index: 0, kind: input, shape index: {}]   ;;  %s116_s1 = inlined_call_operand.hbm [shape: f32[2,32], index: 1, kind: output, shape index: {}]  }
   0x1   :  { %7 = vsyncpa [#allocation4], 0  ;;  %s13_s8 = sshll.u32 %s115_s0, 4  ;;  %s97_s9 = smov [#allocation2]   ;;  %s14_s8 = int_to_ptr.hbm [resolvable:$true] %s13_s8 }
   0x2   :  { %s15_s10 = sshll.u32 %s97_s9, 4  ;;  %s16_s10 = int_to_ptr.vmem [resolvable:$true] %s15_s10 }
   0x3   :  { %18 = dma.hbm_to_vmem [thread:$0]  %s14_s8, 32, %s16_s10, [#allocation3]  }
   0x4   :  { %93 = dma.done.wait [#allocation3], 32  }
   0x5   :  { %94 = vsyncadd [#allocation3], 4294967264  ;;  %s98_s11 = smov [#allocation5]   ;;  %s33_s15 = sshll.u32 %s116_s1, 4  ;;  %vm24_vm0 = vcmask 254976   ;;  %s34_s15 = int_to_ptr.hbm [resolvable:$true] %s33_s15 }
   0x6   :  { %s31_s12 = sshll.u32 %s98_s11, 4  ;;  %v23_v0 = vld [vmem:[#allocation2] sm:$0x3]  ;;  %s32_s12 = int_to_ptr.vmem [resolvable:$true] %s31_s12 }
   0x7   :  { %25 = vst.msk [vmem:[#allocation5] sm:$0x3] %vm24_vm0, %v23_v0 }
   0x8   :  { %36 = dma.vmem_to_hbm [thread:$0]  %s32_s12, 32, %s34_s15, [#allocation4]  }
   0x9   :  { %95 = dma.done.wait [#allocation4], 32  }
   0xa   :  { %96 = vsyncadd [#allocation4], 4294967264 }
   0xb   :  { %41 = vsyncpa [#allocation3], 1 }
   0xc   :  { %42 = vsyncpa [#allocation4], 1 }

</bundles_post_ra>
